<compile_context>
chip_gen: v7x
topology: tpu7x:2x2x1
jax: 0.10.0
libtpu: 0.0.40
codegen_flags: <defaults>
</compile_context>

<pallas_src>
import jax
import jax.numpy as jnp
from jax.experimental import pallas as pl
from jax.experimental.pallas import tpu as pltpu


def mdn_kernel(xT_ref, w1_ref, b1_ref, w2_ref, b2_ref, w3_ref, b3_ref,
               w4_ref, b4_ref, piT_ref, muT_ref, sigT_ref):
    k = piT_ref.shape[0]  # n_components (static)

    # Hidden MLP, batch on the lane axis: h^T = W @ x^T + b.
    # bf16 MXU operands, f32 accumulation, f32 elementwise.
    x = xT_ref[...].astype(jnp.bfloat16)                                   # [in, TB]
    h = jnp.dot(w1_ref[...], x, preferred_element_type=jnp.float32) + b1_ref[...]
    h = jnp.maximum(h, 0.0).astype(jnp.bfloat16)
    h = jnp.dot(w2_ref[...], h, preferred_element_type=jnp.float32) + b2_ref[...]
    h = jnp.maximum(h, 0.0).astype(jnp.bfloat16)
    h = jnp.dot(w3_ref[...], h, preferred_element_type=jnp.float32) + b3_ref[...]
    h = jnp.maximum(h, 0.0).astype(jnp.bfloat16)
    p = jnp.dot(w4_ref[...], h, preferred_element_type=jnp.float32) + b4_ref[...]  # [3K, TB]

    # pi = softmax over the component axis (sublane axis here), numerically stable.
    logits = p[:k, :]
    m = jnp.max(logits, axis=0, keepdims=True)
    e = jnp.exp(logits - m)
    denom = jnp.sum(e, axis=0, keepdims=True)
    piT_ref[...] = e * pl.reciprocal(denom, approx=False)

    # mu = raw slice.
    muT_ref[...] = p[k:2 * k, :]

    # sigma = softplus(s) = max(s, 0) + log1p(exp(-|s|))  (stable form).
    s = p[2 * k:, :]
    sigT_ref[...] = jnp.maximum(s, 0.0) + jnp.log1p(jnp.exp(-jnp.abs(s)))


def mdn_forward(x, params, *, tb=256):
    """x: [B, input_dim] f32.  params: torch-layout weights [out,in] (bf16) and
    biases [out,1] (f32).  Returns (pi, mu, sigma), each [B, n_components] f32."""
    assert tb % 128 == 0, "batch tile must be a multiple of 128 (lane-dense stores)"
    b_rows, in_dim = x.shape
    hidden = params["w1"].shape[0]
    k = params["w4"].shape[0] // 3

    n_blocks = -(-b_rows // tb)
    bp = n_blocks * tb
    xp = x if bp == b_rows else jnp.pad(x, ((0, bp - b_rows), (0, 0)))
    xT = jnp.transpose(xp)  # [in_dim, Bp] — batch on the lane axis

    def resident_spec(a):
        # Full-array block, constant index map => stays in VMEM across the grid.
        return pl.BlockSpec(a.shape, lambda i: (0, 0))

    out_sdt = jax.ShapeDtypeStruct((k, bp), jnp.float32)
    out_spec = pl.BlockSpec((k, tb), lambda i: (0, i))

    flops = 2 * bp * (in_dim * hidden + 2 * hidden * hidden + hidden * 3 * k)
    bytes_accessed = (
        xT.size * 2                                    # bf16-equivalent input traffic
        + sum(params[f"w{j}"].size * 2 + params[f"b{j}"].size * 4 for j in range(1, 5))
        + 3 * k * bp * 4)                              # three f32 outputs
    cost = pl.CostEstimate(flops=flops, transcendentals=3 * k * bp,
                           bytes_accessed=bytes_accessed)

    piT, muT, sigT = pl.pallas_call(
        mdn_kernel,
        grid=(n_blocks,),
        in_specs=[pl.BlockSpec((in_dim, tb), lambda i: (0, i)),
                  resident_spec(params["w1"]), resident_spec(params["b1"]),
                  resident_spec(params["w2"]), resident_spec(params["b2"]),
                  resident_spec(params["w3"]), resident_spec(params["b3"]),
                  resident_spec(params["w4"]), resident_spec(params["b4"])],
        out_specs=(out_spec, out_spec, out_spec),
        out_shape=(out_sdt, out_sdt, out_sdt),
        compiler_params=pltpu.CompilerParams(dimension_semantics=("parallel",)),
        cost_estimate=cost,
    )(xT,
      params["w1"], params["b1"],
      params["w2"], params["b2"],
      params["w3"], params["b3"],
      params["w4"], params["b4"])

    # Layout plumbing back to the PyTorch-facing [B, K] convention.
    pi = jnp.transpose(piT)[:b_rows]
    mu = jnp.transpose(muT)[:b_rows]
    sigma = jnp.transpose(sigT)[:b_rows]
    return pi, mu, sigma


def init_params(key, input_dim, hidden_dim, n_components):
    """PyTorch nn.Linear-style init (U[-1/sqrt(fan_in), +1/sqrt(fan_in)]).
    Weights kept in torch layout [out_features, in_features], cast to bf16 for
    the MXU; biases stored as [out_features, 1] f32 for lane broadcast."""
    dims = [(hidden_dim, input_dim),
            (hidden_dim, hidden_dim),
            (hidden_dim, hidden_dim),
            (3 * n_components, hidden_dim)]
    params = {}
    keys = jax.random.split(key, 2 * len(dims))
    for i, (fan_out, fan_in) in enumerate(dims):
        bound = 1.0 / (float(fan_in) ** 0.5)
        w = jax.random.uniform(keys[2 * i], (fan_out, fan_in), jnp.float32,
                               -bound, bound)
        b = jax.random.uniform(keys[2 * i + 1], (fan_out, 1), jnp.float32,
                               -bound, bound)
        params[f"w{i + 1}"] = w.astype(jnp.bfloat16)
        params[f"b{i + 1}"] = b
    return params


def mdn_reference(x, params):
    """Pure-JAX reference with the same precision policy (bf16 operands at the
    dot boundaries, f32 accumulation/elementwise)."""
    def dense(h, w, b):
        return jnp.dot(h.astype(jnp.bfloat16), w.T,
                       preferred_element_type=jnp.float32) + b[:, 0]

    h = jax.nn.relu(dense(x, params["w1"], params["b1"]))
    h = jax.nn.relu(dense(h, params["w2"], params["b2"]))
    h = jax.nn.relu(dense(h, params["w3"], params["b3"]))
    p = dense(h, params["w4"], params["b4"])
    k = params["w4"].shape[0] // 3
    pi = jax.nn.softmax(p[:, :k], axis=1)
    mu = p[:, k:2 * k]
    sigma = jax.nn.softplus(p[:, 2 * k:])
    return pi, mu, sigma


if __name__ == "__main__":
    # Small shapes consistent with the module's forward (2 grid steps of 256 rows).
    batch, input_dim, hidden_dim, n_components = 512, 4, 32, 4

    key = jax.random.PRNGKey(0)
    k_x, k_p = jax.random.split(key)
    x = jax.random.normal(k_x, (batch, input_dim), jnp.float32)
    params = init_params(k_p, input_dim, hidden_dim, n_components)

    pi, mu, sigma = mdn_forward(x, params)
    jax.block_until_ready((pi, mu, sigma))

    # Sanity check against pure-JAX reference (same bf16-at-dot precision).
    pi_r, mu_r, sigma_r = mdn_reference(x, params)
    assert pi.shape == (batch, n_components)
    assert mu.shape == (batch, n_components)
    assert sigma.shape == (batch, n_components)
    assert jnp.allclose(pi, pi_r, atol=1e-4, rtol=1e-4)
    assert jnp.allclose(mu, mu_r, atol=1e-4, rtol=1e-4)
    assert jnp.allclose(sigma, sigma_r, atol=1e-4, rtol=1e-4)
    assert jnp.allclose(jnp.sum(pi, axis=1), 1.0, atol=1e-5)
    assert bool(jnp.all(sigma >= 0.0))

    print("KERNEL_OK")
</pallas_src>

<mosaic_0001>
module attributes {stable_mosaic.version = 11 : i64} {
  func.func @mdn_kernel(%arg0: i32, %arg1: memref<4x256xf32, #tpu.memory_space<vmem>>, %arg2: memref<32x4xbf16, #tpu.memory_space<vmem>>, %arg3: memref<32x1xf32, #tpu.memory_space<vmem>>, %arg4: memref<32x32xbf16, #tpu.memory_space<vmem>>, %arg5: memref<32x1xf32, #tpu.memory_space<vmem>>, %arg6: memref<32x32xbf16, #tpu.memory_space<vmem>>, %arg7: memref<32x1xf32, #tpu.memory_space<vmem>>, %arg8: memref<12x32xbf16, #tpu.memory_space<vmem>>, %arg9: memref<12x1xf32, #tpu.memory_space<vmem>>, %arg10: memref<4x256xf32, #tpu.memory_space<vmem>>, %arg11: memref<4x256xf32, #tpu.memory_space<vmem>>, %arg12: memref<4x256xf32, #tpu.memory_space<vmem>>) attributes {dimension_semantics = [#tpu.dimension_semantics<parallel>], iteration_bounds = array<i64: 2>, scalar_prefetch = 0 : i64, scratch_operands = 0 : i64, tpu.core_type = #tpu.core_type<tc>, window_params = [{transform_indices = @transform_0, window_bounds = array<i64: 4, 256>}, {pipeline_mode = #tpu.pipeline_mode<synchronous>, transform_indices = @transform_1, window_bounds = array<i64: 32, 4>}, {pipeline_mode = #tpu.pipeline_mode<synchronous>, transform_indices = @transform_2, window_bounds = array<i64: 32, 1>}, {pipeline_mode = #tpu.pipeline_mode<synchronous>, transform_indices = @transform_3, window_bounds = array<i64: 32, 32>}, {pipeline_mode = #tpu.pipeline_mode<synchronous>, transform_indices = @transform_4, window_bounds = array<i64: 32, 1>}, {pipeline_mode = #tpu.pipeline_mode<synchronous>, transform_indices = @transform_5, window_bounds = array<i64: 32, 32>}, {pipeline_mode = #tpu.pipeline_mode<synchronous>, transform_indices = @transform_6, window_bounds = array<i64: 32, 1>}, {pipeline_mode = #tpu.pipeline_mode<synchronous>, transform_indices = @transform_7, window_bounds = array<i64: 12, 32>}, {pipeline_mode = #tpu.pipeline_mode<synchronous>, transform_indices = @transform_8, window_bounds = array<i64: 12, 1>}, {transform_indices = @transform_9, window_bounds = array<i64: 4, 256>}, {transform_indices = @transform_10, window_bounds = array<i64: 4, 256>}, {transform_indices = @transform_11, window_bounds = array<i64: 4, 256>}]} {
    %c0 = arith.constant 0 : index
    %c0_0 = arith.constant 0 : index
    %0 = vector.load %arg1[%c0, %c0_0] : memref<4x256xf32, #tpu.memory_space<vmem>>, vector<4x256xf32>
    %1 = arith.truncf %0 : vector<4x256xf32> to vector<4x256xbf16>
    %c0_1 = arith.constant 0 : index
    %c0_2 = arith.constant 0 : index
    %2 = vector.load %arg2[%c0_1, %c0_2] : memref<32x4xbf16, #tpu.memory_space<vmem>>, vector<32x4xbf16>
    %cst = arith.constant dense<0.000000e+00> : vector<32x256xf32>
    %3 = tpu.matmul %2, %1, %cst {dimension_numbers = #tpu.dot_dimension_numbers<[1], [0], [0], [1], [0, 0, 1, 1], [], []>} : vector<32x4xbf16>, vector<4x256xbf16>, vector<32x256xf32> -> vector<32x256xf32>
    %c0_3 = arith.constant 0 : index
    %c0_4 = arith.constant 0 : index
    %4 = vector.load %arg3[%c0_3, %c0_4] : memref<32x1xf32, #tpu.memory_space<vmem>>, vector<32x1xf32>
    %5 = vector.broadcast %4 : vector<32x1xf32> to vector<32x256xf32>
    %6 = arith.addf %3, %5 : vector<32x256xf32>
    %cst_5 = arith.constant 0.000000e+00 : f32
    %7 = vector.broadcast %cst_5 : f32 to vector<32x256xf32>
    %8 = arith.maximumf %6, %7 : vector<32x256xf32>
    %9 = arith.truncf %8 : vector<32x256xf32> to vector<32x256xbf16>
    %c0_6 = arith.constant 0 : index
    %c0_7 = arith.constant 0 : index
    %10 = vector.load %arg4[%c0_6, %c0_7] : memref<32x32xbf16, #tpu.memory_space<vmem>>, vector<32x32xbf16>
    %cst_8 = arith.constant dense<0.000000e+00> : vector<32x256xf32>
    %11 = tpu.matmul %10, %9, %cst_8 {dimension_numbers = #tpu.dot_dimension_numbers<[1], [0], [0], [1], [0, 0, 1, 1], [], []>} : vector<32x32xbf16>, vector<32x256xbf16>, vector<32x256xf32> -> vector<32x256xf32>
    %c0_9 = arith.constant 0 : index
    %c0_10 = arith.constant 0 : index
    %12 = vector.load %arg5[%c0_9, %c0_10] : memref<32x1xf32, #tpu.memory_space<vmem>>, vector<32x1xf32>
    %13 = vector.broadcast %12 : vector<32x1xf32> to vector<32x256xf32>
    %14 = arith.addf %11, %13 : vector<32x256xf32>
    %cst_11 = arith.constant 0.000000e+00 : f32
    %15 = vector.broadcast %cst_11 : f32 to vector<32x256xf32>
    %16 = arith.maximumf %14, %15 : vector<32x256xf32>
    %17 = arith.truncf %16 : vector<32x256xf32> to vector<32x256xbf16>
    %c0_12 = arith.constant 0 : index
    %c0_13 = arith.constant 0 : index
    %18 = vector.load %arg6[%c0_12, %c0_13] : memref<32x32xbf16, #tpu.memory_space<vmem>>, vector<32x32xbf16>
    %cst_14 = arith.constant dense<0.000000e+00> : vector<32x256xf32>
    %19 = tpu.matmul %18, %17, %cst_14 {dimension_numbers = #tpu.dot_dimension_numbers<[1], [0], [0], [1], [0, 0, 1, 1], [], []>} : vector<32x32xbf16>, vector<32x256xbf16>, vector<32x256xf32> -> vector<32x256xf32>
    %c0_15 = arith.constant 0 : index
    %c0_16 = arith.constant 0 : index
    %20 = vector.load %arg7[%c0_15, %c0_16] : memref<32x1xf32, #tpu.memory_space<vmem>>, vector<32x1xf32>
    %21 = vector.broadcast %20 : vector<32x1xf32> to vector<32x256xf32>
    %22 = arith.addf %19, %21 : vector<32x256xf32>
    %cst_17 = arith.constant 0.000000e+00 : f32
    %23 = vector.broadcast %cst_17 : f32 to vector<32x256xf32>
    %24 = arith.maximumf %22, %23 : vector<32x256xf32>
    %25 = arith.truncf %24 : vector<32x256xf32> to vector<32x256xbf16>
    %c0_18 = arith.constant 0 : index
    %c0_19 = arith.constant 0 : index
    %26 = vector.load %arg8[%c0_18, %c0_19] : memref<12x32xbf16, #tpu.memory_space<vmem>>, vector<12x32xbf16>
    %cst_20 = arith.constant dense<0.000000e+00> : vector<12x256xf32>
    %27 = tpu.matmul %26, %25, %cst_20 {dimension_numbers = #tpu.dot_dimension_numbers<[1], [0], [0], [1], [0, 0, 1, 1], [], []>} : vector<12x32xbf16>, vector<32x256xbf16>, vector<12x256xf32> -> vector<12x256xf32>
    %c0_21 = arith.constant 0 : index
    %c0_22 = arith.constant 0 : index
    %28 = vector.load %arg9[%c0_21, %c0_22] : memref<12x1xf32, #tpu.memory_space<vmem>>, vector<12x1xf32>
    %29 = vector.broadcast %28 : vector<12x1xf32> to vector<12x256xf32>
    %30 = arith.addf %27, %29 : vector<12x256xf32>
    %31 = vector.extract_strided_slice %30 {offsets = [0, 0], sizes = [4, 256], strides = [1, 1]} : vector<12x256xf32> to vector<4x256xf32>
    %cst_23 = arith.constant dense<0xFF800000> : vector<256xf32>
    %32 = vector.multi_reduction <maximumf>, %31, %cst_23 [0] : vector<4x256xf32> to vector<256xf32>
    %33 = vector.shape_cast %32 : vector<256xf32> to vector<1x256xf32>
    %34 = vector.broadcast %33 : vector<1x256xf32> to vector<4x256xf32>
    %35 = arith.subf %31, %34 : vector<4x256xf32>
    %36 = math.exp %35 : vector<4x256xf32>
    %cst_24 = arith.constant dense<0.000000e+00> : vector<256xf32>
    %37 = vector.multi_reduction <add>, %36, %cst_24 [0] : vector<4x256xf32> to vector<256xf32>
    %38 = vector.shape_cast %37 : vector<256xf32> to vector<1x256xf32>
    %39 = tpu.reciprocal %38 : vector<1x256xf32> -> vector<1x256xf32>
    %40 = vector.broadcast %39 : vector<1x256xf32> to vector<4x256xf32>
    %41 = arith.mulf %36, %40 : vector<4x256xf32>
    %c0_25 = arith.constant 0 : index
    %c0_26 = arith.constant 0 : index
    %42 = vector.load %arg10[%c0_25, %c0_26] : memref<4x256xf32, #tpu.memory_space<vmem>>, vector<4x256xf32>
    tpu.vector_store %arg10[%c0_25, %c0_26], %41 {strides = array<i32>} : memref<4x256xf32, #tpu.memory_space<vmem>>, vector<4x256xf32>,
    %43 = vector.extract_strided_slice %30 {offsets = [4, 0], sizes = [4, 256], strides = [1, 1]} : vector<12x256xf32> to vector<4x256xf32>
    %c0_27 = arith.constant 0 : index
    %c0_28 = arith.constant 0 : index
    %44 = vector.load %arg11[%c0_27, %c0_28] : memref<4x256xf32, #tpu.memory_space<vmem>>, vector<4x256xf32>
    tpu.vector_store %arg11[%c0_27, %c0_28], %43 {strides = array<i32>} : memref<4x256xf32, #tpu.memory_space<vmem>>, vector<4x256xf32>,
    %45 = vector.extract_strided_slice %30 {offsets = [8, 0], sizes = [4, 256], strides = [1, 1]} : vector<12x256xf32> to vector<4x256xf32>
    %cst_29 = arith.constant 0.000000e+00 : f32
    %46 = vector.broadcast %cst_29 : f32 to vector<4x256xf32>
    %47 = arith.maximumf %45, %46 : vector<4x256xf32>
    %48 = math.absf %45 : vector<4x256xf32>
    %cst_30 = arith.constant 0.000000e+00 : f32
    %49 = vector.broadcast %cst_30 : f32 to vector<4x256xf32>
    %50 = arith.subf %49, %48 : vector<4x256xf32>
    %51 = math.exp %50 : vector<4x256xf32>
    %52 = math.log1p %51 : vector<4x256xf32>
    %53 = arith.addf %47, %52 : vector<4x256xf32>
    %c0_31 = arith.constant 0 : index
    %c0_32 = arith.constant 0 : index
    %54 = vector.load %arg12[%c0_31, %c0_32] : memref<4x256xf32, #tpu.memory_space<vmem>>, vector<4x256xf32>
    tpu.vector_store %arg12[%c0_31, %c0_32], %53 {strides = array<i32>} : memref<4x256xf32, #tpu.memory_space<vmem>>, vector<4x256xf32>,
    return
  }
  func.func @transform_0(%arg0: i32) -> (i32, i32) {
    %c0_i32 = arith.constant 0 : i32
    %c0_i32_0 = arith.constant 0 : i32
    return %c0_i32, %arg0 : i32, i32
  }
  func.func @transform_1(%arg0: i32) -> (i32, i32) {
    %c0_i32 = arith.constant 0 : i32
    %c0_i32_0 = arith.constant 0 : i32
    %c0_i32_1 = arith.constant 0 : i32
    return %c0_i32, %c0_i32_0 : i32, i32
  }
  func.func @transform_2(%arg0: i32) -> (i32, i32) {
    %c0_i32 = arith.constant 0 : i32
    %c0_i32_0 = arith.constant 0 : i32
    %c0_i32_1 = arith.constant 0 : i32
    return %c0_i32, %c0_i32_0 : i32, i32
  }
  func.func @transform_3(%arg0: i32) -> (i32, i32) {
    %c0_i32 = arith.constant 0 : i32
    %c0_i32_0 = arith.constant 0 : i32
    %c0_i32_1 = arith.constant 0 : i32
    return %c0_i32, %c0_i32_0 : i32, i32
  }
  func.func @transform_4(%arg0: i32) -> (i32, i32) {
    %c0_i32 = arith.constant 0 : i32
    %c0_i32_0 = arith.constant 0 : i32
    %c0_i32_1 = arith.constant 0 : i32
    return %c0_i32, %c0_i32_0 : i32, i32
  }
  func.func @transform_5(%arg0: i32) -> (i32, i32) {
    %c0_i32 = arith.constant 0 : i32
    %c0_i32_0 = arith.constant 0 : i32
    %c0_i32_1 = arith.constant 0 : i32
    return %c0_i32, %c0_i32_0 : i32, i32
  }
  func.func @transform_6(%arg0: i32) -> (i32, i32) {
    %c0_i32 = arith.constant 0 : i32
    %c0_i32_0 = arith.constant 0 : i32
    %c0_i32_1 = arith.constant 0 : i32
    return %c0_i32, %c0_i32_0 : i32, i32
  }
  func.func @transform_7(%arg0: i32) -> (i32, i32) {
    %c0_i32 = arith.constant 0 : i32
    %c0_i32_0 = arith.constant 0 : i32
    %c0_i32_1 = arith.constant 0 : i32
    return %c0_i32, %c0_i32_0 : i32, i32
  }
  func.func @transform_8(%arg0: i32) -> (i32, i32) {
    %c0_i32 = arith.constant 0 : i32
    %c0_i32_0 = arith.constant 0 : i32
    %c0_i32_1 = arith.constant 0 : i32
    return %c0_i32, %c0_i32_0 : i32, i32
  }
  func.func @transform_9(%arg0: i32) -> (i32, i32) {
    %c0_i32 = arith.constant 0 : i32
    %c0_i32_0 = arith.constant 0 : i32
    return %c0_i32, %arg0 : i32, i32
  }
  func.func @transform_10(%arg0: i32) -> (i32, i32) {
    %c0_i32 = arith.constant 0 : i32
    %c0_i32_0 = arith.constant 0 : i32
    return %c0_i32, %arg0 : i32, i32
  }
  func.func @transform_11(%arg0: i32) -> (i32, i32) {
    %c0_i32 = arith.constant 0 : i32
    %c0_i32_0 = arith.constant 0 : i32
    return %c0_i32, %arg0 : i32, i32
  }
}

</mosaic_0001>

<bundles_post_ra>
// kernel: tpu_custom_call.1
= control target key start
LH: loop header
LB: loop body
LE: loop exit
PB: predicated region body
PF: predicated region fallthrough
CT: control target
= control target key end

     0   :  { %17 = vsyncpa [#allocation3], 0  ;;  %s1655_s0 = inlined_call_operand.vmem [shape: f32[4,512], index: 0, kind: input, shape index: {}]   ;;  %s1656_s1 = inlined_call_operand.vmem [shape: bf16[32,4], index: 1, kind: input, shape index: {}]   ;;  %s1657_s2 = inlined_call_operand.vmem [shape: f32[32,1], index: 2, kind: input, shape index: {}]   ;;  %s1658_s3 = inlined_call_operand.vmem [shape: bf16[32,32], index: 3, kind: input, shape index: {}]   ;;  %s1659_s4 = inlined_call_operand.vmem [shape: f32[32,1], index: 4, kind: input, shape index: {}]   ;;  %s1660_s5 = inlined_call_operand.vmem [shape: bf16[32,32], index: 5, kind: input, shape index: {}]   ;;  %s1661_s6 = inlined_call_operand.vmem [shape: f32[32,1], index: 6, kind: input, shape index: {}]   ;;  %s1662_s7 = inlined_call_operand.vmem [shape: bf16[12,32], index: 7, kind: input, shape index: {}]   ;;  %s1663_s8 = inlined_call_operand.vmem [shape: f32[12,1], index: 8, kind: input, shape index: {}]   ;;  %s1664_s9 = inlined_call_operand.hbm [shape: f32[4,512], index: 9, kind: output, shape index: {0}]   ;;  %s1665_s10 = inlined_call_operand.hbm [shape: f32[4,512], index: 10, kind: output, shape index: {1}]   ;;  %s1666_s11 = inlined_call_operand.hbm [shape: f32[4,512], index: 11, kind: output, shape index: {2}]  }
   0x1   :  { %19 = vsyncpa [#allocation3 + $0x1], 0 }
   0x2   :  { %20 = vsyncpa [#allocation5], 0 }
   0x3   :  { %22 = vsyncpa [#allocation5 + $0x1], 0  ;;  %s1375_s17 = smov 0   ;;  %s1377_s18 = smov 0  }
   0x4   :  { %s1379_s19 = smov 0   ;;  %s1381_s20 = smov 0  }
   0x5 LB: > { %1671 = sst [smem:[#allocation9_spill]] %s1305_s19  ;;  %s1396_s21 = sadd.s32 4294967295, %s1309_s20   ;;  %s1309_s20 = sphi %s1381_s20, %s1677_s20   ;;  %s1305_s19 = sphi %s1379_s19, %s1679_s19   ;;  %s1301_s18 = sphi %s1377_s18, %s1681_s18   ;;  %s1297_s17 = sphi %s1375_s17, %s1680_s17  }
   0x6   : > { %s1667_s22 = sadd.s32 4294967294, %s1309_s20   ;;  %s1400_s23 = sadd.s32 1, %s1309_s20  }
   0x7   : > { %1672 = sst [smem:[#allocation10_spill]] %s1400_s23  ;;  %s229_s24 = sadd.s32 1, %s1305_s19 }
   0x8   : > { %s226_s25 = ssub.s32 %s1309_s20, %s1400_s23  ;;  %p239_p0 = scmp.ne.s32.totalorder %s1305_s19, %s1301_s18 }
   0x9   : > { %p227_p1 = scmp.eq.s32.totalorder %s226_s25, 0  ;;  %p240_p2 = scmp.eq.s32.totalorder %s1396_s21, 1 }
   0xa   : > { %p245_p3 = scmp.ne.s32.totalorder %s1301_s18, %s1297_s17  ;;  %p246_p4 = scmp.eq.s32.totalorder %s1667_s22, 1 }
   0xb   : > { %s1413_s26 = scalar_select %p227_p1, %s1305_s19, %s229_s24  }
   0xc   : > { %p1415_p5 = por %p240_p2, %p239_p0  ;;  %p1419_p6 = por %p246_p4, %p245_p3 }
   0xd   : > { %1673 = sst [smem:[#allocation11_spill]] %s1413_s26  ;;  %p1076_p7 = scmp.ge.s32.totalorder %s1309_s20, 1 }
   0xe   : > { %p349_p8 = scmp.lt.s32.totalorder %s1309_s20, 3 }
  0x10   : > { %p350_p9 = pnand %p1076_p7, %p349_p8 }
  0x11   : > { %s1080_s29 = sshll.u32 (!%p350_p9), %s1396_s21, 1  ;;  %v1311_v0 = vmov (!%p350_p9), 0   ;;  %v419_v1 = vld [vmem:[%s1657_s2] sm:$0xff] (!%p350_p9)  ;;  %v421_v2 = vld [vmem:[%s1657_s2 + $0x10] sm:$0xff] (!%p350_p9)  ;;  %v420_v3 = vld [vmem:[%s1657_s2 + $0x8] sm:$0xff] (!%p350_p9)  ;;  %vm460_vm0 = vcmask (!%p350_p9), 1041408  }
  0x12   : > { %353 = sbr.rel (%p350_p9) target bundleno = 1045 (0x415), region = 56  ;;  %p400_p10 = scmp.lt.s32.totalorder (!%p350_p9), %s1080_s29, 3  ;;  %499 = vmatprep.mubr.bf16.mxu0 (!%p350_p9), %v1311_v0  ;;  %1161 = vset.pattern.permute.xlu0 (!%p350_p9), %v1311_v0  ;;  %v422_v4 = vld [vmem:[%s1657_s2 + $0x18] sm:$0xff] (!%p350_p9)  ;;  %v536_v5 = vld [vmem:[%s1659_s4] sm:$0xff] (!%p350_p9)  ;;  %v537_v7 = vld [vmem:[%s1659_s4 + $0x8] sm:$0xff] (!%p350_p9)  ;;  %vm453_vm1 = vcmask (!%p350_p9), 31744  }
  0x13   : > { %1162 = vset.pattern.permute.xlu1 (!%p350_p9), %v1311_v0  ;;  %609 = vmatprep.mubr.bf16.mxu1 (!%p350_p9), %v1311_v0  ;;  %v1164_v12 = vld [vmem:[%s1656_s1] sm:$0xff] (!%p350_p9)   ;;  %v538_v13 = vld [vmem:[%s1659_s4 + $0x10] sm:$0xff] (!%p350_p9)  ;;  %v539_v14 = vld [vmem:[%s1659_s4 + $0x18] sm:$0xff] (!%p350_p9)  ;;  %vm570_vm2 = vcmask (!%p350_p9), 261120   ;;  %vm816_vm3 = vcmask (!%p350_p9), 1043456   ;;  %s905_s16 = sand.u32 (!%p350_p9), 1, %s1396_s21  }
  0x14   : > { %425 = vperm.xlu0 (!%p350_p9), %1161, %v419_v1   ;;  %435 = vperm.xlu1 (!%p350_p9), %1162, %v421_v2   ;;  %v646_v15 = vld [vmem:[%s1661_s6] sm:$0xff] (!%p350_p9)  ;;  %v647_v16 = vld [vmem:[%s1661_s6 + $0x8] sm:$0xff] (!%p350_p9)  ;;  %v648_v18 = vld [vmem:[%s1661_s6 + $0x10] sm:$0xff] (!%p350_p9)  ;;  %s1536_s14 = scalar_lea.sflag (!%p350_p9), [#allocation5], %s905_s16 }
  0x15   : > { %v1165_v17 = vld [vmem:[%s1656_s1 + $0x8] sm:$0xff] (!%p350_p9)   ;;  %v649_v19 = vld [vmem:[%s1661_s6 + $0x18] sm:$0xff] (!%p350_p9)  ;;  %v753_v20 = vld [vmem:[%s1663_s8] sm:$0xff] (!%p350_p9) }
  0x16   : > { %v754_v21 = vld [vmem:[%s1663_s8 + $0x8] sm:$0xf] (!%p350_p9)  ;;  %v1166_v54 = vld [vmem:[%s1658_s3] sm:$0xff] (!%p350_p9)  }
  0x17   : > { %v1167_v55 = vld [vmem:[%s1658_s3 + $0x8] sm:$0xff] (!%p350_p9)  }
  0x18   : > { %430 = vperm.xlu0 (!%p350_p9), %1161, %v420_v3   ;;  %440 = vperm.xlu1 (!%p350_p9), %1162, %v422_v4  }
  0x19   : > { %s1683_s29 = smov (!%p400_p10, %s1080_s29), 3 }
  0x1a   : > { %s1081_s24 = sshll.u32 %s1683_s29, 2  ;;  %s1312_s29 = smov [#allocation4]  }
  0x1b   : > { %s403_s26 = scalar_lea.vmem %s1655_s0, %s1081_s24  ;;  %s1515_s24 = sshll.u32 %s1396_s21, 7 }
  0x1c   : > { %v409_v6 = vld [vmem:[%s403_s26] sm:$0xff]  ;;  %542 = vperm.xlu0 %1161, %v536_v5   ;;  %547 = vperm.xlu1 %1162, %v537_v7   ;;  %s382_s26 = sand.u32 1, %s1301_s18   ;;  %s1530_s13 = scalar_lea.hbm %s1665_s10, %s1515_s24 }
  0x1d   : > { %v411_v8 = vcombine.high %v409_v6, %v409_v6  ;;  %v413_v9 = vpack.c.bf16 %v409_v6, %v409_v6  ;;  %s1509_s15 = sshll.u32 %s382_s26, 3  ;;  %s1191_s19 = sshll.u32 %s1312_s29, 4  ;;  %s1192_s19 = int_to_ptr.vmem [resolvable:$false] %s1191_s19 }
  0x1e   : > { %s391_s25 = scalar_lea.vmem [#allocation4], %s1509_s15  ;;  %s1193_s23 = scalar_lea.vmem %s1192_s19, 256 }
  0x1f   : > { %v414_v10 = vpack.c.bf16 %v411_v8, %v411_v8  ;;  %v462_v11 = vsel %vm460_vm0, %v413_v9, 0  ;;  %s939_s30 = sshll.u32 %s391_s25, 4  ;;  %s1532_s30 = int_to_ptr.vmem [resolvable:$true] %s939_s30 }
  0x20   : > { %552 = vperm.xlu0 %1161, %v538_v13   ;;  %557 = vperm.xlu1 %1162, %v539_v14   ;;  %s1187_s22 = scalar_lea.vmem %s1532_s30, 128  ;;  %p1194_p0 = scmp.lt.s32.totalorder %s1532_s30, %s1192_s19 }
  0x21   : > { %1084 = vmatprep.subr.msk.bf16.mxu0 %vm460_vm0, %v414_v10  ;;  %p1188_p11 = scmp.ne.s32.totalorder %s1532_s30, %s1187_s22  ;;  %p1195_p1 = scmp.lt.s32.totalorder %s1193_s23, %s1187_s22 }
  0x22   : > { %468 = vmatpush1.bf16.msra.mxu0 %v462_v11 }
  0x23   : > { %p1189_p12 = pnand %p1188_p11, %p1415_p5  ;;  %p1196_p2 = por %p1195_p1, %p1194_p0 }
  0x24   : > { %652 = vperm.xlu0 %1161, %v646_v15   ;;  %657 = vperm.xlu1 %1162, %v647_v16  }
  0x25   : > { %1085 = vmatmul.mubr.msk.bf16.vlgmr.msra.gmra.mrb[0].mxu0 %vm453_vm1, %v1164_v12  ;;  %p1190_p13 = pneg %p1189_p12 }
  0x26   : > { %509 = vmatprep.mubr.bf16.mxu0 %v1311_v0 }
  0x27   : > { %p1197_p3 = pnand %p1196_p2, %p1190_p13 }
  0x28   : > { %662 = vperm.xlu0 %1161, %v648_v18   ;;  %667 = vperm.xlu1 %1162, %v649_v19  }
  0x2c   : > { %757 = vperm.xlu0 %1161, %v753_v20   ;;  %762 = vperm.xlu1 %1162, %v754_v21  }
  0x2d   : > { %1086 = vmatmul.mubr.msk.bf16.gmra.mrb[4].mxu0 %vm453_vm1, %v1165_v17 }
  0x2e   : > { %718 = vmatprep.mubr.bf16.mxu0 %v1311_v0 }
  0x93   : > { %v426_v22 = vpop.permute.xlu0 %425  ;;  %v436_v31 = vpop.permute.xlu1 %435 }
  0x97   : > { %v431_v26 = vpop.permute.xlu0 %430  ;;  %v441_v42 = vpop.permute.xlu1 %440 }
  0x9b   : > { %v543_v56 = vpop.permute.xlu0 %542  ;;  %v548_v60 = vpop.permute.xlu1 %547 }
  0x9f   : > { %v553_v8 = vpop.permute.xlu0 %552  ;;  %v558_v13 = vpop.permute.xlu1 %557 }
  0xf8   : > { %v501_v23 = vpop.f32.mrb[0].mxu0 }
  0xf9   : > { %v502_v24 = vadd.f32 %v501_v23, %v426_v22  ;;  %v503_v25 = vpop.f32.mrb[1].mxu0 }
  0xfa   : > { %v504_v27 = vadd.f32 %v503_v25, %v426_v22  ;;  %v505_v28 = vpop.f32.mrb[2].mxu0  ;;  %v1168_v25 = vld [vmem:[%s1660_s5] sm:$0xff]  }
  0xfb   : > { %v506_v29 = vadd.f32 %v505_v28, %v431_v26  ;;  %v507_v30 = vpop.f32.mrb[3].mxu0  ;;  %v520_v33 = vmax.f32 %v502_v24, 0.0 }
  0xfc   : > { %v508_v32 = vadd.f32 %v507_v30, %v431_v26  ;;  %v521_v35 = vmax.f32 %v504_v27, 0.0  ;;  %v1169_v26 = vld [vmem:[%s1660_s5 + $0x8] sm:$0xff]   ;;  %v653_v27 = vpop.permute.xlu0 %652 }
  0xfd   : > { %v522_v34 = vmax.f32 %v506_v29, 0.0 }
  0xfe   : > { %v523_v36 = vmax.f32 %v508_v32, 0.0 }
  0xff   : > { %v528_v37 = vpack.c.bf16 %v522_v34, %v520_v33 }
 0x100   : > { %v511_v38 = vpop.f32.mrb[4].mxu0  ;;  %v529_v39 = vpack.c.bf16 %v523_v36, %v521_v35 }
 0x101   : > { %v512_v40 = vadd.f32 %v511_v38, %v436_v31  ;;  %v513_v41 = vpop.f32.mrb[5].mxu0 }
 0x102   : > { %v514_v43 = vadd.f32 %v513_v41, %v436_v31  ;;  %v515_v44 = vpop.f32.mrb[6].mxu0  ;;  %577 = vmatprep.subr.bf16.mxu1 %v529_v39  ;;  %v658_v31 = vpop.permute.xlu1 %657 }
 0x103   : > { %v516_v45 = vadd.f32 %v515_v44, %v441_v42  ;;  %v517_v46 = vpop.f32.mrb[7].mxu0  ;;  %578 = vmatpush1.bf16.msra.mxu1 %v528_v37  ;;  %v524_v48 = vmax.f32 %v512_v40, 0.0  ;;  %v663_v41 = vpop.permute.xlu0 %662 }
 0x104   : > { %v518_v47 = vadd.f32 %v517_v46, %v441_v42  ;;  %v525_v50 = vmax.f32 %v514_v43, 0.0 }
 0x105   : > { %v526_v49 = vmax.f32 %v516_v45, 0.0 }
 0x106   : > { %v527_v51 = vmax.f32 %v518_v47, 0.0  ;;  %v668_v46 = vpop.permute.xlu1 %667 }
 0x107   : > { %v530_v52 = vpack.c.bf16 %v526_v49, %v524_v48 }
 0x108   : > { %v531_v53 = vpack.c.bf16 %v527_v51, %v525_v50 }
 0x10a   : > { %579 = vmatprep.subr.bf16.mxu1 %v531_v53 }
 0x10b   : > { %580 = vmatpush1.bf16.msra.mxu1 %v530_v52 }
 0x10e   : > { %1089 = vmatmul.mubr.msk.bf16.vlgmr.msra.gmra.mrb[0].mxu1 %vm570_vm2, %v1166_v54 }
 0x10f   : > { %619 = vmatprep.mubr.bf16.mxu1 %v1311_v0 }
 0x116   : > { %1090 = vmatmul.mubr.msk.bf16.gmra.mrb[4].mxu1 %vm570_vm2, %v1167_v55 }
 0x117   : > { %805 = vmatprep.mubr.bf16.mxu1 %v1311_v0 }
 0x1e1   : > { %v611_v57 = vpop.f32.mrb[0].mxu1 }
 0x1e2   : > { %v612_v58 = vadd.f32 %v611_v57, %v543_v56  ;;  %v613_v59 = vpop.f32.mrb[1].mxu1 }
 0x1e3   : > { %v614_v61 = vadd.f32 %v613_v59, %v543_v56  ;;  %v615_v62 = vpop.f32.mrb[2].mxu1  ;;  %v758_v59 = vpop.permute.xlu0 %757 }
 0x1e4   : > { %v616_v63 = vadd.f32 %v615_v62, %v548_v60  ;;  %v617_v1 = vpop.f32.mrb[3].mxu1  ;;  %v630_v3 = vmax.f32 %v612_v58, 0.0  ;;  %v1170_v58 = vld [vmem:[%s1662_s7] sm:$0x3f]  }
 0x1e5   : > { %v618_v2 = vadd.f32 %v617_v1, %v548_v60  ;;  %v631_v5 = vmax.f32 %v614_v61, 0.0 }
 0x1e6   : > { %v632_v4 = vmax.f32 %v616_v63, 0.0  ;;  %v763_v63 = vpop.permute.xlu1 %762 }
 0x1e7   : > { %v633_v6 = vmax.f32 %v618_v2, 0.0 }
 0x1e8   : > { %v638_v7 = vpack.c.bf16 %v632_v4, %v630_v3 }
 0x1e9   : > { %v639_v9 = vpack.c.bf16 %v633_v6, %v631_v5  ;;  %v621_v10 = vpop.f32.mrb[4].mxu1 }
 0x1ea   : > { %v622_v11 = vadd.f32 %v621_v10, %v553_v8  ;;  %v623_v12 = vpop.f32.mrb[5].mxu1 }
 0x1eb   : > { %v624_v14 = vadd.f32 %v623_v12, %v553_v8  ;;  %v625_v15 = vpop.f32.mrb[6].mxu1  ;;  %686 = vmatprep.subr.bf16.mxu0 %v639_v9 }
 0x1ec   : > { %v626_v16 = vadd.f32 %v625_v15, %v558_v13  ;;  %v627_v17 = vpop.f32.mrb[7].mxu1  ;;  %687 = vmatpush1.bf16.msra.mxu0 %v638_v7  ;;  %v634_v19 = vmax.f32 %v622_v11, 0.0 }
 0x1ed   : > { %v628_v18 = vadd.f32 %v627_v17, %v558_v13  ;;  %v635_v21 = vmax.f32 %v624_v14, 0.0 }
 0x1ee   : > { %v636_v20 = vmax.f32 %v626_v16, 0.0 }
 0x1ef   : > { %v637_v22 = vmax.f32 %v628_v18, 0.0 }
 0x1f0   : > { %v640_v23 = vpack.c.bf16 %v636_v20, %v634_v19 }
 0x1f1   : > { %v641_v24 = vpack.c.bf16 %v637_v22, %v635_v21 }
 0x1f3   : > { %688 = vmatprep.subr.bf16.mxu0 %v641_v24 }
 0x1f4   : > { %689 = vmatpush1.bf16.msra.mxu0 %v640_v23 }
 0x1f7   : > { %1093 = vmatmul.mubr.msk.bf16.vlgmr.msra.gmra.mrb[8].mxu0 %vm570_vm2, %v1168_v25 }
 0x1f8   : > { %728 = vmatprep.mubr.bf16.mxu0 %v1311_v0 }
 0x1ff   : > { %1094 = vmatmul.mubr.msk.bf16.gmra.mrb[12].mxu0 %vm570_vm2, %v1169_v26 }
 0x2ca   : > { %v720_v28 = vpop.f32.mrb[8].mxu0 }
 0x2cb   : > { %v721_v29 = vadd.f32 %v720_v28, %v653_v27  ;;  %v722_v30 = vpop.f32.mrb[9].mxu0 }
 0x2cc   : > { %v723_v32 = vadd.f32 %v722_v30, %v653_v27  ;;  %v724_v33 = vpop.f32.mrb[10].mxu0 }
 0x2cd   : > { %v725_v34 = vadd.f32 %v724_v33, %v658_v31  ;;  %v726_v35 = vpop.f32.mrb[11].mxu0  ;;  %v739_v37 = vmax.f32 %v721_v29, 0.0 }
 0x2ce   : > { %v727_v36 = vadd.f32 %v726_v35, %v658_v31  ;;  %v740_v39 = vmax.f32 %v723_v32, 0.0 }
 0x2cf   : > { %v741_v38 = vmax.f32 %v725_v34, 0.0 }
 0x2d0   : > { %v742_v0 = vmax.f32 %v727_v36, 0.0 }
 0x2d1   : > { %v747_v40 = vpack.c.bf16 %v741_v38, %v739_v37 }
 0x2d2   : > { %v748_v42 = vpack.c.bf16 %v742_v0, %v740_v39  ;;  %v730_v43 = vpop.f32.mrb[12].mxu0 }
 0x2d3   : > { %v731_v44 = vadd.f32 %v730_v43, %v663_v41  ;;  %v732_v45 = vpop.f32.mrb[13].mxu0 }
 0x2d4   : > { %v733_v47 = vadd.f32 %v732_v45, %v663_v41  ;;  %v734_v48 = vpop.f32.mrb[14].mxu0  ;;  %773 = vmatprep.subr.bf16.mxu1 %v748_v42 }
 0x2d5   : > { %v735_v49 = vadd.f32 %v734_v48, %v668_v46  ;;  %v736_v50 = vpop.f32.mrb[15].mxu0  ;;  %774 = vmatpush1.bf16.msra.mxu1 %v747_v40  ;;  %v743_v52 = vmax.f32 %v731_v44, 0.0 }
 0x2d6   : > { %v737_v51 = vadd.f32 %v736_v50, %v668_v46  ;;  %v744_v54 = vmax.f32 %v733_v47, 0.0 }
 0x2d7   : > { %v745_v53 = vmax.f32 %v735_v49, 0.0 }
 0x2d8   : > { %v746_v55 = vmax.f32 %v737_v51, 0.0 }
 0x2d9   : > { %v749_v56 = vpack.c.bf16 %v745_v53, %v743_v52 }
 0x2da   : > { %v750_v57 = vpack.c.bf16 %v746_v55, %v744_v54 }
 0x2dc   : > { %775 = vmatprep.subr.bf16.mxu1 %v750_v57 }
 0x2dd   : > { %776 = vmatpush1.bf16.msra.mxu1 %v749_v56 }
 0x2e0   : > { %1096 = vmatmul.mubr.msk.bf16.vlgmr.msra.gmra.mrb[8].mxu1 %vm570_vm2, %v1170_v58 }
 0x3b3   : > { %v807_v60 = vpop.f32.mrb[8].mxu1 }
 0x3b4   : > { %v1512_v61 = vadd.f32 %v807_v60, %v758_v59  ;;  %v809_v62 = vpop.f32.mrb[9].mxu1 }
 0x3b5   : > { %v810_v1 = vadd.f32 %v809_v62, %v758_v59  ;;  %v811_v2 = vpop.f32.mrb[10].mxu1 }
 0x3b6   : > { %v817_v3 = vsel %vm816_vm3, %v1512_v61, -inf  ;;  %v1520_v4 = vadd.f32 %v811_v2, %v763_v63  ;;  %v813_v5 = vpop.f32.mrb[11].mxu1 }
 0x3b7   : > { %v818_v6 = vrot.slane %v817_v3, 4  ;;  %v824_v7 = vsel %vm816_vm3, %v810_v1, -inf  ;;  %v862_v8 = vcombine.high %v1512_v61, %v810_v1  ;;  %v1524_v9 = vadd.f32 %v813_v5, %v763_v63 }
 0x3b8   : > { %v825_v10 = vrot.slane %v824_v7, 4  ;;  %v867_v11 = vand.u32 2147483647, %v1520_v4 }
 0x3b9   : > { %v819_v12 = vmax.f32 %v817_v3, %v818_v6  ;;  %v868_v13 = vand.u32 2147483647, %v1524_v9  ;;  %864 = vst [vmem:[%s391_s25] sm:$0xff] %v862_v8 }
 0x3ba   : > { %v826_v14 = vmax.f32 %v824_v7, %v825_v10  ;;  %v869_v15 = vsub.f32 0.0, %v867_v11 }
 0x3bb   : > { %1200 = shalt.err (!%p1197_p3)
}
 0x3bc   : > { %s1201_s16 = scalar_lea.hbm %s1530_s13, 128  ;;  %s1205_s12 = scalar_lea.hbm %s1665_s10, 256 }
 0x3bd   : > { %p1202_p4 = scmp.ne.s32.totalorder %s1530_s13, %s1201_s16  ;;  %p1206_p9 = scmp.lt.u32.totalorder %s1530_s13, %s1665_s10 }
 0x3be   : > { %p1207_p10 = scmp.lt.u32.totalorder %s1205_s12, %s1201_s16  ;;  %p1209_p12 = scmp.lt.u32.totalorder %s1201_s16, %s1530_s13 }
 0x3bf   : > { %p1203_p7 = pnand %p1202_p4, %p1415_p5 }
 0x3c0   : > { %p1208_p11 = por %p1207_p10, %p1206_p9 }
 0x3c1   : > { %p1204_p8 = pneg %p1203_p7 }
 0x3c2   : > { %p1210_p13 = por %p1209_p12, %p1208_p11 }
 0x3c4   : > { %p1211_p0 = pnand %p1210_p13, %p1204_p8 }
 0x3c6   : > { %1214 = shalt.err (!%p1211_p0)
}
 0x3c7   : > { %1112 = dma.vmem_to_hbm [thread:$0]  (%p1415_p5), %s1532_s30, 128, %s1530_s13, %s1536_s14   ;;  %v820_v16 = vrot.slane %v819_v12, 2  ;;  %v870_v17 = vsub.f32 0.0, %v868_v13  ;;  %v827_v18 = vrot.slane %v826_v14, 2  ;;  %v871_v19 = vmul.f32 1.442695, %v869_v15 }
 0x3c8   : > { %v865_v50 = vmax.f32 %v1520_v4, 0.0  ;;  %v866_v58 = vmax.f32 %v1524_v9, 0.0  ;;  %s398_s30 = scalar_lea.vmem [#allocation6], %s1509_s15  ;;  %s1576_s16 = scalar_lea.hbm %s1666_s11, %s1515_s24 }
 0x3c9   : > { %v821_v20 = vmax.f32 %v819_v12, %v820_v16  ;;  %v873_v21 = vmul.f32 1.442695, %v870_v17  ;;  %v828_v22 = vmax.f32 %v826_v14, %v827_v18  ;;  %1171 = vpow2.f32 %v871_v19  ;;  %s953_s13 = sshll.u32 %s398_s30, 4  ;;  %s1313_s21 = smov [#allocation6]   ;;  %s1578_s13 = int_to_ptr.vmem [resolvable:$true] %s953_s13 }
 0x3ca   : > { %s1215_s25 = scalar_lea.vmem %s1578_s13, 128  ;;  %s1219_s12 = sshll.u32 %s1313_s21, 4  ;;  %s1220_s12 = int_to_ptr.vmem [resolvable:$false] %s1219_s12 }
 0x3cb   : > { %v822_v23 = vrot.slane %v821_v20, 1  ;;  %1173 = vpow2.f32 %v873_v21  ;;  %v829_v24 = vrot.slane %v828_v22, 1  ;;  %p1216_p1 = scmp.ne.s32.totalorder %s1578_s13, %s1215_s25  ;;  %s1221_s29 = scalar_lea.vmem %s1220_s12, 256 }
 0x3cc   : > { %p1222_p4 = scmp.lt.s32.totalorder %s1578_s13, %s1220_s12  ;;  %p1223_p7 = scmp.lt.s32.totalorder %s1221_s29, %s1215_s25 }
 0x3cd   : > { %v823_v25 = vmax.f32 %v821_v20, %v822_v23  ;;  %v830_v26 = vmax.f32 %v828_v22, %v829_v24  ;;  %p1217_p2 = pnand %p1216_p1, %p1415_p5 }
 0x3ce   : > { %p1224_p8 = por %p1223_p7, %p1222_p4 }
 0x3cf   : > { %v831_v27 = vsub.f32 %v1512_v61, %v823_v25  ;;  %v832_v28 = vsub.f32 %v810_v1, %v830_v26  ;;  %p1218_p3 = pneg %p1217_p2 }
 0x3d1   : > { %v833_v29 = vmul.f32 1.442695, %v831_v27  ;;  %v835_v30 = vmul.f32 1.442695, %v832_v28  ;;  %p1225_p9 = pnand %p1224_p8, %p1218_p3 }
 0x3d3   : > { %1175 = vpow2.f32 %v833_v29  ;;  %v1172_v31 = vpop.eup %1171 }
 0x3d4   : > { %1177 = vpow2.f32 %v835_v30  ;;  %v875_v33 = vadd.f32 1.0, %v1172_v31  ;;  %v878_v35 = vmul.f32 -0.5, %v1172_v31  ;;  %v881_v42 = vand.u32 2147483647, %v1172_v31 }
 0x3d5   : > { %v1174_v32 = vpop.eup %1173 }
 0x3d6   : > { %v884_v34 = vadd.f32 1.0, %v1174_v32  ;;  %1179 = vlog2.f32 %v875_v33  ;;  %v887_v36 = vmul.f32 -0.5, %v1174_v32  ;;  %v879_v0 = vadd.f32 1.0, %v878_v35 }
 0x3d7   : > { %v890_v45 = vand.u32 2147483647, %v1174_v32  ;;  %vm882_vm4 = vcmp.lt.f32.partialorder %v881_v42, 0.0004427343 }
 0x3d8   : > { %1181 = vlog2.f32 %v884_v34  ;;  %v888_v43 = vadd.f32 1.0, %v887_v36  ;;  %v880_v52 = vmul.f32 %v1172_v31, %v879_v0 }
 0x3d9   : > { %vm891_vm5 = vcmp.lt.f32.partialorder %v890_v45, 0.0004427343 }
 0x3da   : > { %v889_v55 = vmul.f32 %v1174_v32, %v888_v43 }
 0x3dd   : > { %v1561_v37 = vpop.eup %1175 }
 0x3de   : > { %v1563_v38 = vpop.eup %1177  ;;  %v837_v39 = vsel %vm816_vm3, %v1561_v37, 0.0 }
 0x3df   : > { %v838_v40 = vrot.slane %v837_v39, 4  ;;  %v844_v41 = vsel %vm816_vm3, %v1563_v38, 0.0 }
 0x3e0   : > { %v845_v44 = vrot.slane %v844_v41, 4  ;;  %v1180_v46 = vpop.eup %1179 }
 0x3e1   : > { %v839_v47 = vadd.f32 %v838_v40, %v837_v39  ;;  %v877_v51 = vmul.f32 0.6931472, %v1180_v46 }
 0x3e2   : > { %v1182_v48 = vpop.eup %1181  ;;  %v846_v49 = vadd.f32 %v845_v44, %v844_v41 }
 0x3e3   : > { %v840_v53 = vrot.slane %v839_v47, 2  ;;  %v886_v54 = vmul.f32 0.6931472, %v1182_v48  ;;  %v883_v57 = vsel %vm882_vm4, %v880_v52, %v877_v51 }
 0x3e4   : > { %v847_v56 = vrot.slane %v846_v49, 2  ;;  %v893_v60 = vadd.f32 %v883_v57, %v865_v50 }
 0x3e5   : > { %v841_v59 = vadd.f32 %v840_v53, %v839_v47  ;;  %v892_v61 = vsel %vm891_vm5, %v889_v55, %v886_v54 }
 0x3e6   : > { %v848_v62 = vadd.f32 %v847_v56, %v846_v49  ;;  %v894_v63 = vadd.f32 %v892_v61, %v866_v58 }
 0x3e7   : > { %v842_v1 = vrot.slane %v841_v59, 1 }
 0x3e8   : > { %v897_v2 = vcombine.low %v893_v60, %v894_v63  ;;  %v849_v3 = vrot.slane %v848_v62, 1 }
 0x3e9   : > { %v843_v4 = vadd.f32 %v842_v1, %v841_v59 }
 0x3ea   : > { %v850_v5 = vadd.f32 %v849_v3, %v848_v62  ;;  %899 = vst [vmem:[%s398_s30] sm:$0xff] %v897_v2 }
 0x3eb   : > { %1183 = vrcp.f32 %v843_v4 }
 0x3ec   : > { %1228 = shalt.err (!%p1225_p9)
}
 0x3ed   : > { %s1229_s19 = scalar_lea.hbm %s1576_s16, 128  ;;  %s1233_s23 = scalar_lea.hbm %s1666_s11, 256 }
 0x3ee   : > { %p1230_p10 = scmp.ne.s32.totalorder %s1576_s16, %s1229_s19  ;;  %p1234_p13 = scmp.lt.u32.totalorder %s1576_s16, %s1666_s11 }
 0x3ef   : > { %p1235_p0 = scmp.lt.u32.totalorder %s1233_s23, %s1229_s19  ;;  %p1237_p2 = scmp.lt.u32.totalorder %s1229_s19, %s1576_s16 }
 0x3f0   : > { %p1231_p11 = pnand %p1230_p10, %p1415_p5 }
 0x3f1   : > { %p1236_p1 = por %p1235_p0, %p1234_p13 }
 0x3f2   : > { %p1232_p12 = pneg %p1231_p11 }
 0x3f3   : > { %p1238_p3 = por %p1237_p2, %p1236_p1 }
 0x3f5   : > { %p1239_p4 = pnand %p1238_p3, %p1232_p12 }
 0x3f7   : > { %1242 = shalt.err (!%p1239_p4)
}
 0x3f8   : > { %1113 = dma.vmem_to_hbm [thread:$0]  (%p1415_p5), %s1578_s13, 128, %s1576_s16, %s1536_s14   ;;  %1185 = vrcp.f32 %v850_v5  ;;  %v1184_v6 = vpop.eup %1183 }
 0x3f9   : > { %v853_v8 = vmul.f32 %v1184_v6, %v1561_v37  ;;  %s384_s25 = scalar_lea.vmem [#allocation2], %s1509_s15  ;;  %s1609_s22 = scalar_lea.hbm %s1664_s9, %s1515_s24 }
 0x3fa   : > { %s925_s29 = sshll.u32 %s384_s25, 4  ;;  %s901_s14 = scalar_lea.sflag [#allocation3], %s382_s26  ;;  %s1611_s29 = int_to_ptr.vmem [resolvable:$true] %s925_s29 }
 0x3fb   : > { %s1243_s13 = scalar_lea.vmem %s1611_s29, 128  ;;  %s1314_s15 = smov [#allocation2]  }
 0x3fc   : > { %p1244_p7 = scmp.ne.s32.totalorder %s1611_s29, %s1243_s13  ;;  %s1247_s16 = sshll.u32 %s1314_s15, 4  ;;  %s1248_s16 = int_to_ptr.vmem [resolvable:$false] %s1247_s16 }
 0x3fd   : > { %s1249_s23 = scalar_lea.vmem %s1248_s16, 256  ;;  %p1250_p10 = scmp.lt.s32.totalorder %s1611_s29, %s1248_s16 }
 0x3fe   : > { %p1245_p8 = pnand %p1244_p7, %p1415_p5  ;;  %p1251_p11 = scmp.lt.s32.totalorder %s1249_s23, %s1243_s13 }
 0x400   : > { %p1246_p9 = pneg %p1245_p8  ;;  %p1252_p12 = por %p1251_p11, %p1250_p10 }
 0x402   : > { %v1186_v7 = vpop.eup %1185  ;;  %p1253_p13 = pnand %p1252_p12, %p1246_p9 }
 0x403   : > { %v854_v9 = vmul.f32 %v1186_v7, %v1563_v38 }
 0x405   : > { %v857_v10 = vcombine.low %v853_v8, %v854_v9 }
 0x407   : > { %859 = vst [vmem:[%s384_s25] sm:$0xff] %v857_v10 }
 0x408   : > { %1256 = shalt.err (!%p1253_p13)
}
 0x409   : > { %s1257_s26 = scalar_lea.hbm %s1609_s22, 128  ;;  %s1261_s12 = scalar_lea.hbm %s1664_s9, 256 }
 0x40a   : > { %p1258_p0 = scmp.ne.s32.totalorder %s1609_s22, %s1257_s26  ;;  %p1262_p3 = scmp.lt.u32.totalorder %s1609_s22, %s1664_s9 }
 0x40b   : > { %p1263_p4 = scmp.lt.u32.totalorder %s1261_s12, %s1257_s26  ;;  %p1265_p8 = scmp.lt.u32.totalorder %s1257_s26, %s1609_s22 }
 0x40c   : > { %p1259_p1 = pnand %p1258_p0, %p1415_p5 }
 0x40d   : > { %p1264_p7 = por %p1263_p4, %p1262_p3 }
 0x40e   : > { %p1260_p2 = pneg %p1259_p1 }
 0x40f   : > { %p1266_p9 = por %p1265_p8, %p1264_p7 }
 0x411   : > { %p1267_p10 = pnand %p1266_p9, %p1260_p2 }
 0x413   : > { %1270 = shalt.err (!%p1267_p10)
}
 0x414   : > { %1111 = dma.vmem_to_hbm [thread:$0]  (%p1415_p5), %s1611_s29, 128, %s1609_s22, %s901_s14  }
 0x415 PF: > { %p1127_p11 = scmp.ge.s32.totalorder %s1309_s20, 2  ;;  %s965_s30 = sand.u32 1, %s1297_s17  }
 0x416   : > { %s966_s13 = scalar_lea.sflag [#allocation3], %s965_s30 }
 0x417   : > { %p1118_p12 = pnand %p1127_p11, %p1419_p6 }
 0x419   : > { %1288 = dma.done.wait (!%p1118_p12), %s966_s13, 128  }
 0x41a   : > { %1290 = vsyncadd (!%p1118_p12), %s966_s13, 4294967168  ;;  %s1676_s15 = sadd.s32 4294967294, %s1309_s20  }
 0x41b   : > { %s974_s16 = sand.u32 1, %s1676_s15  }
 0x41c   : > { %s975_s23 = scalar_lea.sflag [#allocation5], %s974_s16 }
 0x41d   : > { %1292 = dma.done.wait (!%p1118_p12), %s975_s23, 256  }
 0x41e   : > { %1294 = vsyncadd (!%p1118_p12), %s975_s23, 4294967040  ;;  %s1677_s20 = sld [smem:[#allocation10_spill]]  ;;  %s1678_s27 = sld [smem:[#allocation9_spill]] }
 0x41f   : > { %s1679_s19 = sld [smem:[#allocation11_spill]]  ;;  %s1680_s17 = smov %s1301_s18 }
 0x424   : > { %p25_p5 = scmp.ge.s32.totalorder %s1677_s20, 4   ;;  %s1681_s18 = smov %s1678_s27 }
 0x426   :  { %27 = sbr.rel (!%p25_p5) target bundleno = 5 (0x5), region = 123 }
 0x42d   :  { %989 = vsyncpa [#allocation3], 1 }
 0x42e   :  { %991 = vsyncpa [#allocation3 + $0x1], 1 }
 0x42f   :  { %992 = vsyncpa [#allocation5], 1 }
 0x430   :  { %994 = vsyncpa [#allocation5 + $0x1], 1 }

</bundles_post_ra>
